<compile_context>
chip_gen: v6e
topology: v6e:2x2x1
jax: 0.10.0
libtpu: 0.0.40
codegen_flags: <defaults>
</compile_context>

<pallas_src>
import functools

import jax
import jax.numpy as jnp
from jax import lax
from jax.experimental import pallas as pl
from jax.experimental.pallas import tpu as pltpu


_LANES = 128
_SUBLANES = 8
# Inner accumulation chunk (rows of 128 lanes): bounds f32 temporaries to
# ~0.5 MiB each inside a grid step.
_CHUNK_ROWS = 1024
# ~8 MiB per input per grid step on the single-sample (large-D) path
# (review: v7x retune; also fine on v5e/v6e with 128 MiB VMEM).
_TARGET_BLOCK_BYTES_1D = 8 * 1024 * 1024
# Multi-sample (small-D) path sized by ELEMENTS (no inner chunking there), so
# f32 temporaries stay <= ~4 MiB each regardless of the input dtype.
_TARGET_BLOCK_ELEMS_ND = 1 << 20
_MAX_BLOCK_SAMPLES = 1024
_VMEM_LIMIT_BYTES = 48 * 1024 * 1024


def _round_up(x, m):
    return ((x + m - 1) // m) * m


def _dice_stats_kernel(x_ref, t_ref, inter_ref, denom_ref, *,
                       d_real, step_rows, chunk_rows, need_mask,
                       apply_sigmoid, approx_sigmoid):
    """Accumulate per-sample lane-partial sums of x*t and x+t.

    x_ref, t_ref:          (BN, step_rows, 128) input blocks (native dtype).
    inter_ref, denom_ref:  (BN, 1, 128) f32 accumulators, revisited across the
                           reduction (k) axis.
    """
    k = pl.program_id(1)
    num_chunks = step_rows // chunk_rows  # static; step_rows % chunk_rows == 0

    @pl.when(k == 0)
    def _init():
        inter_ref[...] = jnp.zeros_like(inter_ref)
        denom_ref[...] = jnp.zeros_like(denom_ref)

    if need_mask:
        # Hoisted out of the chunk loop (JAX does not CSE broadcast_in_dim).
        row_i = lax.broadcasted_iota(jnp.int32, (chunk_rows, _LANES), 0)
        lane_i = lax.broadcasted_iota(jnp.int32, (chunk_rows, _LANES), 1)
        local_idx = row_i * _LANES + lane_i
    else:
        local_idx = None

    def chunk_stats(start_row):
        x = x_ref[:, pl.ds(start_row, chunk_rows), :].astype(jnp.float32)
        t = t_ref[:, pl.ds(start_row, chunk_rows), :].astype(jnp.float32)
        if apply_sigmoid:
            if approx_sigmoid:
                # EUP approx reciprocal: keeps the v5e sigmoid path off the
                # exact-divide critical path (negligible error for a loss).
                x = pl.reciprocal(1.0 + jnp.exp(-x), approx=True)
            else:
                x = jax.nn.sigmoid(x)
        prod = x * t
        ssum = x + t  # fused x_sum + t_sum
        if need_mask:
            # Global element index of this chunk's first element; elements at
            # or beyond d_real are padding / out-of-bounds garbage -> zero.
            limit = d_real - (k * step_rows + start_row) * _LANES
            valid = (local_idx < limit)[None, :, :]
            prod = jnp.where(valid, prod, 0.0)
            ssum = jnp.where(valid, ssum, 0.0)
        # Lane-parallel partial reductions (sublane/tile axis only); the single
        # 128-lane cross-lane reduce happens once, in the JAX epilogue.
        return (jnp.sum(prod, axis=1, keepdims=True),   # (BN, 1, 128)
                jnp.sum(ssum, axis=1, keepdims=True))   # (BN, 1, 128)

    if num_chunks == 1:
        part_i, part_d = chunk_stats(0)
    else:
        def body(c, carry):
            acc_i, acc_d = carry
            start = pl.multiple_of(c * chunk_rows, chunk_rows)
            ci, cd = chunk_stats(start)
            return acc_i + ci, acc_d + cd

        zeros = jnp.zeros(inter_ref.shape, jnp.float32)
        part_i, part_d = lax.fori_loop(0, num_chunks, body, (zeros, zeros))

    inter_ref[...] += part_i
    denom_ref[...] += part_d


def dice_loss(inputs, target, activation: str = "none", *,
              approx_sigmoid: bool = False,
              block_samples=None, block_rows=None, chunk_rows=None):
    """Pallas-TPU implementation of DiceLoss.forward.

    inputs, target: identical shapes (N, ...) (everything past axis 0 is
    flattened, mirroring `view(N, -1)`).  Returns a scalar float32 loss.
    `block_samples` / `block_rows` / `chunk_rows` are testing hooks to force a
    particular tiling on small inputs.
    """
    assert inputs.shape == target.shape
    n = inputs.shape[0]
    apply_sigmoid = activation == "sigmoid"

    # Native dtypes end-to-end: bf16/i8 targets stream fewer HBM bytes.
    x2d = jnp.reshape(inputs, (n, -1))
    t2d = jnp.reshape(target, (n, -1))
    d = x2d.shape[1]

    rows = pl.cdiv(d, _LANES)
    d128 = rows * _LANES
    if d128 != d:
        # Minimal pad to the 128-lane boundary only (values are irrelevant —
        # the kernel masks the tail with an iota compare, dtype-agnostic).
        # When D % 128 == 0 (common for segmentation) this path is skipped and
        # the reshape below is a zero-copy view: no extra HBM traffic.
        # TODO(synk): a fully copy-free path for D % 128 != 0 needs a
        #             segmented flat-row reduction; not worth it for this loss.
        x2d = jnp.pad(x2d, ((0, 0), (0, d128 - d)))
        t2d = jnp.pad(t2d, ((0, 0), (0, d128 - d)))
    x3 = jnp.reshape(x2d, (n, rows, _LANES))
    t3 = jnp.reshape(t2d, (n, rows, _LANES))

    itemsize = max(x3.dtype.itemsize, t3.dtype.itemsize)

    # ---- block sizing -------------------------------------------------------
    if block_samples is not None:
        bn = int(block_samples)
    else:
        bn = _TARGET_BLOCK_ELEMS_ND // (rows * _LANES)
    bn = max(1, min(bn, n, _MAX_BLOCK_SAMPLES))

    if bn > 1:
        # Small-D / large-N regime: pack whole samples per grid step; block is
        # <= ~1M elements so no inner chunking is needed.
        ts = rows
        ch = rows
    else:
        # Large-D regime: one sample per step, ~8 MiB per input per step,
        # processed in ~1024-row chunks inside the step.
        target_rows = max(1, _TARGET_BLOCK_BYTES_1D // (_LANES * itemsize))
        ts_req = int(block_rows) if block_rows is not None else target_rows
        ts_req = max(1, min(ts_req, rows))
        ch_req = max(1, int(chunk_rows) if chunk_rows is not None else _CHUNK_ROWS)
        nc = pl.cdiv(ts_req, ch_req)
        ch = _round_up(pl.cdiv(ts_req, nc), _SUBLANES)
        ts = ch * nc
    assert ts % ch == 0

    num_k = pl.cdiv(rows, ts)
    num_i = pl.cdiv(n, bn)
    need_mask = (num_k * ts != rows) or (d128 != d)

    kernel = functools.partial(
        _dice_stats_kernel,
        d_real=d, step_rows=ts, chunk_rows=ch, need_mask=need_mask,
        apply_sigmoid=apply_sigmoid, approx_sigmoid=approx_sigmoid)

    inter_stats, denom_stats = pl.pallas_call(
        kernel,
        out_shape=(jax.ShapeDtypeStruct((n, 1, _LANES), jnp.float32),
                   jax.ShapeDtypeStruct((n, 1, _LANES), jnp.float32)),
        grid_spec=pltpu.PrefetchScalarGridSpec(
            num_scalar_prefetch=0,
            grid=(num_i, num_k),  # reduction axis last
            in_specs=[
                pl.BlockSpec((bn, ts, _LANES), lambda i, k: (i, k, 0)),
                pl.BlockSpec((bn, ts, _LANES), lambda i, k: (i, k, 0)),
            ],
            out_specs=[
                pl.BlockSpec((bn, 1, _LANES), lambda i, k: (i, 0, 0)),
                pl.BlockSpec((bn, 1, _LANES), lambda i, k: (i, 0, 0)),
            ],
        ),
        compiler_params=pltpu.CompilerParams(
            dimension_semantics=("parallel", "arbitrary"),
            vmem_limit_bytes=_VMEM_LIMIT_BYTES,
        ),
    )(x3, t3)

    # Tiny epilogue: one cross-lane reduce + scalar Dice combine.
    inter = jnp.sum(inter_stats[:, 0, :], axis=-1)   # (N,)
    denom = jnp.sum(denom_stats[:, 0, :], axis=-1)   # (N,)
    smooth = jnp.float32(1.0)
    dice = 2.0 * (inter + smooth) / (denom + smooth)
    return (1.0 - jnp.sum(dice) / n).astype(jnp.float32)


def _dice_loss_ref(inputs, target, activation: str = "none"):
    # Pure-JAX reference mirroring the PyTorch module exactly.
    if activation == "sigmoid":
        inputs = jax.nn.sigmoid(inputs.astype(jnp.float32))
    n = target.shape[0]
    smooth = 1.0
    xf = jnp.reshape(inputs, (n, -1)).astype(jnp.float32)
    tf = jnp.reshape(target, (n, -1)).astype(jnp.float32)
    inter = xf * tf
    loss = 2.0 * (inter.sum(1) + smooth) / (xf.sum(1) + tf.sum(1) + smooth)
    return 1.0 - loss.sum() / n


if __name__ == "__main__":
    key = jax.random.PRNGKey(0)
    k1, k2 = jax.random.split(key)

    # 1) Base path: D % 128 == 0 -> zero-copy lane fold, multi-sample block.
    N, C, H, W = 2, 4, 16, 16
    pred = jax.random.uniform(k1, (N, C, H, W), dtype=jnp.float32)
    targ = (jax.random.uniform(k2, (N, C, H, W)) > 0.5).astype(jnp.float32)
    out = jax.block_until_ready(dice_loss(pred, targ, activation="none"))
    ref = _dice_loss_ref(pred, targ, activation="none")
    assert jnp.allclose(out, ref, atol=1e-5, rtol=1e-5), (out, ref)

    # 2) Sigmoid-activation path (exact sigmoid).
    out_s = jax.block_until_ready(dice_loss(pred, targ, activation="sigmoid"))
    ref_s = _dice_loss_ref(pred, targ, activation="sigmoid")
    assert jnp.allclose(out_s, ref_s, atol=1e-5, rtol=1e-5), (out_s, ref_s)

    # 3) Approximate (EUP) sigmoid path.
    out_a = jax.block_until_ready(
        dice_loss(pred, targ, activation="sigmoid", approx_sigmoid=True))
    assert jnp.allclose(out_a, ref_s, atol=2e-3, rtol=2e-3), (out_a, ref_s)

    # 4) Native bf16 streaming (no wrapper up-cast; f32 accumulation in-kernel).
    pred_bf = pred.astype(jnp.bfloat16)
    out_bf = jax.block_until_ready(dice_loss(pred_bf, targ, activation="none"))
    ref_bf = _dice_loss_ref(pred_bf.astype(jnp.float32), targ, activation="none")
    assert jnp.allclose(out_bf, ref_bf, atol=1e-3, rtol=1e-3), (out_bf, ref_bf)

    # 5) Non-128-aligned D (exercises the in-kernel lane-tail mask) + sigmoid.
    N2, C2, H2, W2 = 3, 3, 17, 19   # D = 969
    p2 = jax.random.uniform(k1, (N2, C2, H2, W2), dtype=jnp.float32)
    t2 = (jax.random.uniform(k2, (N2, C2, H2, W2)) > 0.5).astype(jnp.float32)
    out2 = jax.block_until_ready(dice_loss(p2, t2, activation="sigmoid"))
    ref2 = _dice_loss_ref(p2, t2, activation="sigmoid")
    assert jnp.allclose(out2, ref2, atol=1e-5, rtol=1e-5), (out2, ref2)

    # 6) Same shapes with a partial sample block (n=3, 2 samples per block).
    out2b = jax.block_until_ready(
        dice_loss(p2, t2, activation="sigmoid", block_samples=2))
    assert jnp.allclose(out2b, ref2, atol=1e-5, rtol=1e-5), (out2b, ref2)

    # 7) Force a multi-step reduction grid (accumulator init/accumulate path).
    N3, C3, H3, W3 = 2, 4, 32, 16   # D = 2048 -> 16 rows; ts=8 -> 2 k-steps
    p3 = jax.random.uniform(k1, (N3, C3, H3, W3), dtype=jnp.float32)
    t3 = (jax.random.uniform(k2, (N3, C3, H3, W3)) > 0.5).astype(jnp.float32)
    out3 = jax.block_until_ready(
        dice_loss(p3, t3, activation="none", block_samples=1, block_rows=8))
    ref3 = _dice_loss_ref(p3, t3, activation="none")
    assert jnp.allclose(out3, ref3, atol=1e-5, rtol=1e-5), (out3, ref3)

    # 8) Inner chunk loop + row-tail masking (D = 2560 -> 20 rows; ts=16, ch=8).
    N4, C4, H4, W4 = 2, 4, 40, 16
    p4 = jax.random.uniform(k1, (N4, C4, H4, W4), dtype=jnp.float32)
    t4 = (jax.random.uniform(k2, (N4, C4, H4, W4)) > 0.5).astype(jnp.float32)
    out4 = jax.block_until_ready(
        dice_loss(p4, t4, activation="none",
                  block_samples=1, block_rows=16, chunk_rows=8))
    ref4 = _dice_loss_ref(p4, t4, activation="none")
    assert jnp.allclose(out4, ref4, atol=1e-5, rtol=1e-5), (out4, ref4)

    print("KERNEL_OK")
</pallas_src>

<mosaic_0001>
module attributes {stable_mosaic.version = 11 : i64} {
  func.func @_dice_stats_kernel(%arg0: i32, %arg1: i32, %arg2: memref<2x8x128xf32, #tpu.memory_space<vmem>>, %arg3: memref<2x8x128xf32, #tpu.memory_space<vmem>>, %arg4: memref<2x1x128xf32, #tpu.memory_space<vmem>>, %arg5: memref<2x1x128xf32, #tpu.memory_space<vmem>>) attributes {dimension_semantics = [#tpu.dimension_semantics<parallel>, #tpu.dimension_semantics<arbitrary>], iteration_bounds = array<i64: 1, 1>, scalar_prefetch = 0 : i64, scratch_operands = 0 : i64, tpu.core_type = #tpu.core_type<tc>, window_params = [{transform_indices = @transform_0, window_bounds = array<i64: 2, 8, 128>}, {transform_indices = @transform_1, window_bounds = array<i64: 2, 8, 128>}, {transform_indices = @transform_2, window_bounds = array<i64: 2, 1, 128>}, {transform_indices = @transform_3, window_bounds = array<i64: 2, 1, 128>}]} {
    %c0_i32 = arith.constant 0 : i32
    %0 = arith.cmpi eq, %arg1, %c0_i32 : i32
    %1 = arith.extui %0 : i1 to i32
    %c0_i32_0 = arith.constant 0 : i32
    %2 = arith.cmpi ne, %1, %c0_i32_0 : i32
    scf.if %2 {
      %cst_19 = arith.constant 0.000000e+00 : f32
      %17 = vector.broadcast %cst_19 : f32 to vector<2x1x128xf32>
      %c0_20 = arith.constant 0 : index
      %c0_21 = arith.constant 0 : index
      %c0_22 = arith.constant 0 : index
      %18 = vector.load %arg4[%c0_20, %c0_21, %c0_22] : memref<2x1x128xf32, #tpu.memory_space<vmem>>, vector<2x1x128xf32>
      tpu.vector_store %arg4[%c0_20, %c0_21, %c0_22], %17 {strides = array<i32>} : memref<2x1x128xf32, #tpu.memory_space<vmem>>, vector<2x1x128xf32>,
      %cst_23 = arith.constant 0.000000e+00 : f32
      %19 = vector.broadcast %cst_23 : f32 to vector<2x1x128xf32>
      %c0_24 = arith.constant 0 : index
      %c0_25 = arith.constant 0 : index
      %c0_26 = arith.constant 0 : index
      %20 = vector.load %arg5[%c0_24, %c0_25, %c0_26] : memref<2x1x128xf32, #tpu.memory_space<vmem>>, vector<2x1x128xf32>
      tpu.vector_store %arg5[%c0_24, %c0_25, %c0_26], %19 {strides = array<i32>} : memref<2x1x128xf32, #tpu.memory_space<vmem>>, vector<2x1x128xf32>,
    } else {
    }
    %c0 = arith.constant 0 : index
    %c0_1 = arith.constant 0 : index
    %c0_2 = arith.constant 0 : index
    %3 = vector.load %arg2[%c0, %c0_1, %c0_2] : memref<2x8x128xf32, #tpu.memory_space<vmem>>, vector<2x8x128xf32>
    %c0_3 = arith.constant 0 : index
    %c0_4 = arith.constant 0 : index
    %c0_5 = arith.constant 0 : index
    %4 = vector.load %arg3[%c0_3, %c0_4, %c0_5] : memref<2x8x128xf32, #tpu.memory_space<vmem>>, vector<2x8x128xf32>
    %5 = arith.mulf %3, %4 : vector<2x8x128xf32>
    %6 = arith.addf %3, %4 : vector<2x8x128xf32>
    %cst = arith.constant dense<0.000000e+00> : vector<2x128xf32>
    %7 = vector.multi_reduction <add>, %5, %cst [1] : vector<2x8x128xf32> to vector<2x128xf32>
    %8 = vector.shape_cast %7 : vector<2x128xf32> to vector<2x1x128xf32>
    %cst_6 = arith.constant dense<0.000000e+00> : vector<2x128xf32>
    %9 = vector.multi_reduction <add>, %6, %cst_6 [1] : vector<2x8x128xf32> to vector<2x128xf32>
    %10 = vector.shape_cast %9 : vector<2x128xf32> to vector<2x1x128xf32>
    %c0_7 = arith.constant 0 : index
    %c0_8 = arith.constant 0 : index
    %c0_9 = arith.constant 0 : index
    %11 = vector.load %arg4[%c0_7, %c0_8, %c0_9] : memref<2x1x128xf32, #tpu.memory_space<vmem>>, vector<2x1x128xf32>
    %12 = arith.addf %11, %8 : vector<2x1x128xf32>
    %c0_10 = arith.constant 0 : index
    %c0_11 = arith.constant 0 : index
    %c0_12 = arith.constant 0 : index
    %13 = vector.load %arg4[%c0_10, %c0_11, %c0_12] : memref<2x1x128xf32, #tpu.memory_space<vmem>>, vector<2x1x128xf32>
    tpu.vector_store %arg4[%c0_10, %c0_11, %c0_12], %12 {strides = array<i32>} : memref<2x1x128xf32, #tpu.memory_space<vmem>>, vector<2x1x128xf32>,
    %c0_13 = arith.constant 0 : index
    %c0_14 = arith.constant 0 : index
    %c0_15 = arith.constant 0 : index
    %14 = vector.load %arg5[%c0_13, %c0_14, %c0_15] : memref<2x1x128xf32, #tpu.memory_space<vmem>>, vector<2x1x128xf32>
    %15 = arith.addf %14, %10 : vector<2x1x128xf32>
    %c0_16 = arith.constant 0 : index
    %c0_17 = arith.constant 0 : index
    %c0_18 = arith.constant 0 : index
    %16 = vector.load %arg5[%c0_16, %c0_17, %c0_18] : memref<2x1x128xf32, #tpu.memory_space<vmem>>, vector<2x1x128xf32>
    tpu.vector_store %arg5[%c0_16, %c0_17, %c0_18], %15 {strides = array<i32>} : memref<2x1x128xf32, #tpu.memory_space<vmem>>, vector<2x1x128xf32>,
    return
  }
  func.func @transform_0(%arg0: i32, %arg1: i32) -> (i32, i32, i32) {
    %c0_i32 = arith.constant 0 : i32
    %c0_i32_0 = arith.constant 0 : i32
    return %arg0, %arg1, %c0_i32 : i32, i32, i32
  }
  func.func @transform_1(%arg0: i32, %arg1: i32) -> (i32, i32, i32) {
    %c0_i32 = arith.constant 0 : i32
    %c0_i32_0 = arith.constant 0 : i32
    return %arg0, %arg1, %c0_i32 : i32, i32, i32
  }
  func.func @transform_2(%arg0: i32, %arg1: i32) -> (i32, i32, i32) {
    %c0_i32 = arith.constant 0 : i32
    %c0_i32_0 = arith.constant 0 : i32
    %c0_i32_1 = arith.constant 0 : i32
    return %arg0, %c0_i32, %c0_i32_0 : i32, i32, i32
  }
  func.func @transform_3(%arg0: i32, %arg1: i32) -> (i32, i32, i32) {
    %c0_i32 = arith.constant 0 : i32
    %c0_i32_0 = arith.constant 0 : i32
    %c0_i32_1 = arith.constant 0 : i32
    return %arg0, %c0_i32, %c0_i32_0 : i32, i32, i32
  }
}

</mosaic_0001>

<bundles_post_ra>
// kernel: tpu_custom_call.1
= control target key start
LH: loop header
LB: loop body
LE: loop exit
PB: predicated region body
PF: predicated region fallthrough
CT: control target
= control target key end

     0   :  { %9 = vsyncpa [#allocation3], 0  ;;  %s267_s0 = inlined_call_operand.hbm [shape: f32[2,8,128], index: 0, kind: input, shape index: {}]   ;;  %s268_s1 = inlined_call_operand.hbm [shape: f32[2,8,128], index: 1, kind: input, shape index: {}]   ;;  %s269_s2 = inlined_call_operand.hbm [shape: f32[2,1,128], index: 2, kind: output, shape index: {0}]   ;;  %s270_s3 = inlined_call_operand.hbm [shape: f32[2,1,128], index: 3, kind: output, shape index: {1}]  }
   0x1   :  { %10 = vsyncpa [#allocation6], 0 }
   0x2   :  { %11 = vsyncpa [#allocation4], 0 }
   0x3   :  { %12 = vsyncpa [#allocation9], 0  ;;  %s226_s12 = smov [#allocation2]  }
   0x4   :  { %s18_s13 = sshll.u32 %s226_s12, 4  ;;  %s19_s13 = int_to_ptr.vmem [resolvable:$true] %s18_s13 }
   0x5   :  { %s146_s14 = scalar_lea.vmem %s19_s13, 256  ;;  %p151_p1 = scmp.lt.s32.totalorder %s19_s13, %s19_s13 }
   0x6   :  { %p147_p0 = scmp.ne.s32.totalorder %s19_s13, %s146_s14  ;;  %p152_p2 = scmp.lt.s32.totalorder %s146_s14, %s146_s14 }
   0x8   :  { %p153_p3 = por %p152_p2, %p151_p1 }
   0xa   :  { %p154_p4 = pnand %p153_p3, %p147_p0 }
   0xc   :  { %157 = shalt.err (!%p154_p4)
}
   0xd   :  { %s227_s15 = smov 128   ;;  %s228_s16 = smov 8  }
   0xe   :  { %24 = dma.hbm_to_vmem [thread:$0]  %s267_s0, 256, %s19_s13, [#allocation3], %s227_s15, %s227_s15, %s228_s16  }
   0xf   :  { %s229_s19 = smov [#allocation5]  }
  0x10   :  { %s30_s20 = sshll.u32 %s229_s19, 4  ;;  %s31_s20 = int_to_ptr.vmem [resolvable:$true] %s30_s20 }
  0x11   :  { %s166_s21 = scalar_lea.vmem %s31_s20, 256  ;;  %p171_p6 = scmp.lt.s32.totalorder %s31_s20, %s31_s20 }
  0x12   :  { %p167_p5 = scmp.ne.s32.totalorder %s31_s20, %s166_s21  ;;  %p172_p7 = scmp.lt.s32.totalorder %s166_s21, %s166_s21 }
  0x14   :  { %p173_p8 = por %p172_p7, %p171_p6 }
  0x16   :  { %p174_p9 = pnand %p173_p8, %p167_p5 }
  0x18   :  { %177 = shalt.err (!%p174_p9)
}
  0x19   :  { %36 = dma.hbm_to_vmem [thread:$0]  %s268_s1, 256, %s31_s20, [#allocation6], %s227_s15, %s227_s15, %s228_s16  }
  0x1a   :  { %218 = dma.done.wait [#allocation3], 256  }
  0x1b   :  { %219 = vsyncadd [#allocation3], 4294967040 }
  0x1c   :  { %220 = dma.done.wait [#allocation6], 256  }
  0x1d   :  { %221 = vsyncadd [#allocation6], 4294967040  ;;  %v230_v0 = vmov 0.0   ;;  %v51_v1 = vld [vmem:[#allocation2] sm:$0xff]  ;;  %v53_v2 = vld [vmem:[#allocation5] sm:$0xff]  ;;  %s231_s0 = smov [#allocation7]  }
  0x1e   :  { %47 = vst [vmem:[#allocation7] sm:$0x1] %v230_v0  ;;  %48 = vst [vmem:[#allocation7 + $0x1] sm:$0x1] %v230_v0  ;;  %v52_v3 = vld [vmem:[#allocation2 + $0x8] sm:$0xff]  ;;  %v55_v4 = vmul.f32 %v53_v2, %v51_v1  ;;  %v54_v5 = vld [vmem:[#allocation5 + $0x8] sm:$0xff]  ;;  %v57_v6 = vadd.f32 %v53_v2, %v51_v1 }
  0x1f   :  { %49 = vst [vmem:[#allocation8] sm:$0x1] %v230_v0  ;;  %50 = vst [vmem:[#allocation8 + $0x1] sm:$0x1] %v230_v0  ;;  %v56_v7 = vmul.f32 %v54_v5, %v52_v3  ;;  %v58_v8 = vadd.f32 %v54_v5, %v52_v3  ;;  %s100_s1 = sshll.u32 %s231_s0, 4  ;;  %s232_s24 = smov [#allocation8]   ;;  %s101_s1 = int_to_ptr.vmem [resolvable:$true] %s100_s1 }
  0x20   :  { %v59_v9 = vrot.slane %v55_v4, 4  ;;  %v71_v10 = vrot.slane %v57_v6, 4  ;;  %s112_s25 = sshll.u32 %s232_s24, 4  ;;  %s178_s26 = scalar_lea.vmem %s101_s1, 32  ;;  %s113_s25 = int_to_ptr.vmem [resolvable:$true] %s112_s25 }
  0x21   :  { %v65_v11 = vrot.slane %v56_v7, 4  ;;  %v77_v12 = vrot.slane %v58_v8, 4  ;;  %p179_p10 = scmp.ne.s32.totalorder %s101_s1, %s178_s26  ;;  %p183_p11 = scmp.lt.s32.totalorder %s101_s1, %s101_s1 }
  0x22   :  { %v60_v13 = vadd.f32 %v59_v9, %v55_v4  ;;  %v72_v14 = vadd.f32 %v71_v10, %v57_v6  ;;  %p184_p12 = scmp.lt.s32.totalorder %s178_s26, %s178_s26 }
  0x23   :  { %v66_v15 = vadd.f32 %v65_v11, %v56_v7  ;;  %v78_v16 = vadd.f32 %v77_v12, %v58_v8 }
  0x24   :  { %v61_v17 = vrot.slane %v60_v13, 2  ;;  %v73_v18 = vrot.slane %v72_v14, 2  ;;  %p185_p13 = por %p184_p12, %p183_p11 }
  0x25   :  { %v67_v19 = vrot.slane %v66_v15, 2  ;;  %v79_v20 = vrot.slane %v78_v16, 2  ;;  %v83_v27 = vld [vmem:[#allocation7] sm:$0x1]  ;;  %v84_v32 = vld [vmem:[#allocation7 + $0x1] sm:$0x1] }
  0x26   :  { %v62_v21 = vadd.f32 %v61_v17, %v60_v13  ;;  %v74_v22 = vadd.f32 %v73_v18, %v72_v14  ;;  %v89_v29 = vld [vmem:[#allocation8] sm:$0x1]  ;;  %v90_v34 = vld [vmem:[#allocation8 + $0x1] sm:$0x1]  ;;  %p186_p0 = pnand %p185_p13, %p179_p10 }
  0x27   :  { %v68_v23 = vadd.f32 %v67_v19, %v66_v15  ;;  %v80_v24 = vadd.f32 %v79_v20, %v78_v16 }
  0x28   :  { %v63_v25 = vrot.slane %v62_v21, 1  ;;  %v75_v26 = vrot.slane %v74_v22, 1 }
  0x29   :  { %v69_v28 = vrot.slane %v68_v23, 1  ;;  %v81_v30 = vrot.slane %v80_v24, 1 }
  0x2a   :  { %v64_v31 = vadd.f32 %v63_v25, %v62_v21  ;;  %v76_v33 = vadd.f32 %v75_v26, %v74_v22 }
  0x2b   :  { %v70_v35 = vadd.f32 %v69_v28, %v68_v23  ;;  %v82_v36 = vadd.f32 %v81_v30, %v80_v24 }
  0x2c   :  { %v85_v37 = vadd.f32 %v83_v27, %v64_v31  ;;  %v91_v38 = vadd.f32 %v89_v29, %v76_v33 }
  0x2d   :  { %v86_v39 = vadd.f32 %v84_v32, %v70_v35  ;;  %v92_v40 = vadd.f32 %v90_v34, %v82_v36 }
  0x2e   :  { %87 = vst [vmem:[#allocation7] sm:$0x1] %v85_v37  ;;  %93 = vst [vmem:[#allocation8] sm:$0x1] %v91_v38 }
  0x2f   :  { %88 = vst [vmem:[#allocation7 + $0x1] sm:$0x1] %v86_v39  ;;  %94 = vst [vmem:[#allocation8 + $0x1] sm:$0x1] %v92_v40 }
  0x30   :  { %189 = shalt.err (!%p186_p0)
}
  0x31   :  { %s233_s27 = smov 16   ;;  %s234_s28 = smov 1  }
  0x32   :  { %106 = dma.vmem_to_hbm [thread:$0]  %s101_s1, 32, %s269_s2, [#allocation4], %s233_s27, %s233_s27, %s234_s28  }
  0x33   :  { %s198_s4 = scalar_lea.vmem %s113_s25, 32  ;;  %p203_p2 = scmp.lt.s32.totalorder %s113_s25, %s113_s25 }
  0x34   :  { %p199_p1 = scmp.ne.s32.totalorder %s113_s25, %s198_s4  ;;  %p204_p3 = scmp.lt.s32.totalorder %s198_s4, %s198_s4 }
  0x36   :  { %p205_p4 = por %p204_p3, %p203_p2 }
  0x38   :  { %p206_p5 = pnand %p205_p4, %p199_p1 }
  0x3a   :  { %209 = shalt.err (!%p206_p5)
}
  0x3b   :  { %118 = dma.vmem_to_hbm [thread:$0]  %s113_s25, 32, %s270_s3, [#allocation9], %s233_s27, %s233_s27, %s234_s28  }
  0x3c   :  { %222 = dma.done.wait [#allocation4], 32  }
  0x3d   :  { %223 = vsyncadd [#allocation4], 4294967264 }
  0x3e   :  { %224 = dma.done.wait [#allocation9], 32  }
  0x3f   :  { %225 = vsyncadd [#allocation9], 4294967264 }
  0x40   :  { %125 = vsyncpa [#allocation3], 1 }
  0x41   :  { %126 = vsyncpa [#allocation6], 1 }
  0x42   :  { %127 = vsyncpa [#allocation4], 1 }
  0x43   :  { %128 = vsyncpa [#allocation9], 1 }

</bundles_post_ra>
